<compile_context>
chip_gen: v6e
topology: v6e:2x2x1
jax: 0.10.0
libtpu: 0.0.40
codegen_flags: <defaults>
</compile_context>

<pallas_src>
import jax
import jax.numpy as jnp
from jax.experimental import pallas as pl
from jax.experimental.pallas import tpu as pltpu


# ------------------------------ Pallas kernels ------------------------------

def conv_stats_kernel(w_ref, p_ref, y_ref, s_ref):
    """Fused im2col-matmul conv + per-tile BN partial statistics.

    w_ref : (Cout, K)        bf16  (grid-invariant, stays resident)
    p_ref : (1, K, TS)       bf16  im2col patches (channel-major K)
    y_ref : (1, Cout, TS)    f32   conv output tile (lane-dense)
    s_ref : (1, 1, Cout, 2)  f32   per-tile [sum, sum-of-squares]
    """
    y = jnp.dot(w_ref[...], p_ref[0],
                preferred_element_type=jnp.float32)        # (Cout, TS) on MXU
    y_ref[0] = y
    # Lane-axis reductions (XLU has slack in this mem-bound kernel).
    # TODO(synk): for very large P a Welford / pre-shifted accumulation would be
    # safer than E[y^2] - E[y]^2 against cancellation.
    s_ref[0, 0, :, 0:1] = jnp.sum(y, axis=1, keepdims=True)
    s_ref[0, 0, :, 1:2] = jnp.sum(y * y, axis=1, keepdims=True)


def bn_relu_kernel(y_ref, a_ref, b_ref, o_ref):
    """Folded BatchNorm (per-channel scale/shift) + ReLU.

    y_ref : (1, Cout, TS) f32
    a_ref : (Cout, 1)     f32   scale = gamma / sqrt(var + eps)
    b_ref : (Cout, 1)     f32   shift = beta - mean * scale
    o_ref : (1, Cout, TS) f32
    """
    o_ref[0] = jnp.maximum(y_ref[0] * a_ref[...] + b_ref[...], 0.0)


# -------------------------------- JAX glue ----------------------------------

def _im2col_channel_major(x, ksize, stride, padding):
    """x: (N, Cin, D, H, W) -> patchesT (N, K, S).

    K = Cin*kd*kh*kw ordered to match weight.reshape(Cout, -1);
    S = Do*Ho*Wo row-major.
    """
    N, C, D, H, W = x.shape
    kd, kh, kw = ksize
    p = padding
    xp = jnp.pad(x, ((0, 0), (0, 0), (p, p), (p, p), (p, p)))
    Do = (D + 2 * p - kd) // stride + 1
    Ho = (H + 2 * p - kh) // stride + 1
    Wo = (W + 2 * p - kw) // stride + 1

    cols = []
    for dz in range(kd):
        for dy in range(kh):
            for dx in range(kw):
                cols.append(
                    xp[:, :,
                       dz: dz + stride * (Do - 1) + 1: stride,
                       dy: dy + stride * (Ho - 1) + 1: stride,
                       dx: dx + stride * (Wo - 1) + 1: stride])  # (N,C,Do,Ho,Wo)
    pat = jnp.stack(cols, axis=2)            # (N, C, kd*kh*kw, Do, Ho, Wo)
    K = C * kd * kh * kw
    S = Do * Ho * Wo
    # TODO(synk): build patches inside the conv kernel (kd*kh*kw shifted matmuls
    # over a VMEM-resident input tile) to avoid the 27x im2col blow-up in HBM.
    return pat.reshape(N, K, S), (Do, Ho, Wo)


def _pick_spatial_tile(S, K):
    """Largest multiple-of-128 tile dividing S whose double-buffered bf16
    patches block stays inside a conservative VMEM budget (fits v7x's 64 MiB)."""
    budget = 8 * 1024 * 1024                  # bytes for 2 x (K, TS) bf16 buffers
    ts = 1024
    while ts >= 128:
        if S % ts == 0 and 2 * K * ts * 2 <= budget:
            return ts
        ts -= 128
    raise ValueError("Do*Ho*Wo must be a multiple of 128")
    # TODO(synk): ragged S would need a masked tail tile in both kernels.


def conv3d_block(x, weight, bias, gamma, beta, *, stride, padding, eps=1e-3):
    """Conv3d + BatchNorm3d (batch statistics, train mode) + ReLU.

    NCDHW in / NCDHW out.  `bias` is accepted for API parity but folded away:
    train-mode BN mean subtraction cancels any constant per-channel shift.
    """
    del bias
    Cout, Cin, kd, kh, kw = weight.shape
    patchesT, (Do, Ho, Wo) = _im2col_channel_major(x, (kd, kh, kw), stride, padding)
    N, K, S = patchesT.shape
    TS = _pick_spatial_tile(S, K)
    n_sp = S // TS
    grid = (N, n_sp)

    w2d = weight.reshape(Cout, K).astype(jnp.bfloat16)      # (Cout, K)
    patchesT = patchesT.astype(jnp.bfloat16)                # (N, K, S)

    # --- kernel 1: conv matmul + fused BN partial stats (all axes parallel) ---
    y, part = pl.pallas_call(
        conv_stats_kernel,
        out_shape=(jax.ShapeDtypeStruct((N, Cout, S), jnp.float32),
                   jax.ShapeDtypeStruct((N, n_sp, Cout, 2), jnp.float32)),
        grid_spec=pltpu.PrefetchScalarGridSpec(
            num_scalar_prefetch=0,
            grid=grid,
            in_specs=[
                pl.BlockSpec((Cout, K), lambda n, j: (0, 0)),
                pl.BlockSpec((1, K, TS), lambda n, j: (n, 0, j)),
            ],
            out_specs=(
                pl.BlockSpec((1, Cout, TS), lambda n, j: (n, 0, j)),
                pl.BlockSpec((1, 1, Cout, 2), lambda n, j: (n, j, 0, 0)),
            ),
        ),
        compiler_params=pltpu.CompilerParams(
            dimension_semantics=("parallel", "parallel")),
    )(w2d, patchesT)

    # --- tiny finish of stats + fold BN into one (scale, shift) per channel ---
    count = float(N * S)
    tot = jnp.sum(part, axis=(0, 1))                        # (Cout, 2)
    mean = tot[:, 0] / count
    var = tot[:, 1] / count - mean * mean                   # biased var (BN fwd)
    scale = gamma.astype(jnp.float32) / jnp.sqrt(var + eps)
    shift = beta.astype(jnp.float32) - mean * scale
    scale2 = scale.reshape(Cout, 1)
    shift2 = shift.reshape(Cout, 1)

    # --- kernel 2: y * scale + shift, ReLU (lane-dense loads and stores) ---
    out = pl.pallas_call(
        bn_relu_kernel,
        out_shape=jax.ShapeDtypeStruct((N, Cout, S), jnp.float32),
        grid_spec=pltpu.PrefetchScalarGridSpec(
            num_scalar_prefetch=0,
            grid=grid,
            in_specs=[
                pl.BlockSpec((1, Cout, TS), lambda n, j: (n, 0, j)),
                pl.BlockSpec((Cout, 1), lambda n, j: (0, 0)),
                pl.BlockSpec((Cout, 1), lambda n, j: (0, 0)),
            ],
            out_specs=pl.BlockSpec((1, Cout, TS), lambda n, j: (n, 0, j)),
        ),
        compiler_params=pltpu.CompilerParams(
            dimension_semantics=("parallel", "parallel")),
    )(y, scale2, shift2)

    # (N, Cout, S) -> (N, Cout, Do, Ho, Wo): free reshape, no transpose pass.
    return out.reshape(N, Cout, Do, Ho, Wo)


# -------------------------------- reference ---------------------------------

def reference(x, weight, bias, gamma, beta, *, stride, padding, eps=1e-3):
    y = jax.lax.conv_general_dilated(
        x, weight,
        window_strides=(stride,) * 3,
        padding=[(padding, padding)] * 3,
        dimension_numbers=("NCDHW", "OIDHW", "NCDHW"),
        precision=jax.lax.Precision.HIGHEST,
    ) + bias[None, :, None, None, None]
    mean = jnp.mean(y, axis=(0, 2, 3, 4), keepdims=True)
    var = jnp.var(y, axis=(0, 2, 3, 4), keepdims=True)      # biased, like BN fwd
    yn = (y - mean) / jnp.sqrt(var + eps)
    yn = yn * gamma[None, :, None, None, None] + beta[None, :, None, None, None]
    return jnp.maximum(yn, 0.0)


# ----------------------------------- main ------------------------------------

if __name__ == "__main__":
    # Conv3dBlock(in_channel=4, out_channel=8, kernel_size=3, stride=1, padding=1)
    # on an input of (2, 4, 8, 8, 8)  ->  S = Do*Ho*Wo = 512 (one lane-dense tile).
    N, Cin, D, H, W = 2, 4, 8, 8, 8
    Cout, ksz, stride, padding = 8, 3, 1, 1

    key = jax.random.PRNGKey(0)
    kx, kw_, kb = jax.random.split(key, 3)
    x = jax.random.normal(kx, (N, Cin, D, H, W), dtype=jnp.float32)
    weight = 0.1 * jax.random.normal(kw_, (Cout, Cin, ksz, ksz, ksz), jnp.float32)
    bias = 0.1 * jax.random.normal(kb, (Cout,), jnp.float32)
    gamma = jnp.ones((Cout,), jnp.float32)    # BatchNorm3d default init
    beta = jnp.zeros((Cout,), jnp.float32)

    # Pre-round x / weight to bf16 so the bf16 MXU path and the f32 reference
    # see bit-identical operands (bf16 x bf16 products accumulate exactly in f32),
    # keeping the comparison tolerance tight.
    x = x.astype(jnp.bfloat16).astype(jnp.float32)
    weight = weight.astype(jnp.bfloat16).astype(jnp.float32)

    out = conv3d_block(x, weight, bias, gamma, beta,
                       stride=stride, padding=padding, eps=1e-3)
    out = jax.block_until_ready(out)

    ref = reference(x, weight, bias, gamma, beta,
                    stride=stride, padding=padding, eps=1e-3)
    assert out.shape == ref.shape == (N, Cout, D, H, W)
    assert jnp.allclose(out, ref, rtol=1e-3, atol=1e-3), (
        float(jnp.max(jnp.abs(out - ref))))

    print("KERNEL_OK")
</pallas_src>

<mosaic_0001>
module attributes {stable_mosaic.version = 11 : i64} {
  func.func @conv_stats_kernel(%arg0: i32, %arg1: i32, %arg2: memref<8x108xbf16, #tpu.memory_space<vmem>>, %arg3: memref<1x108x512xbf16, #tpu.memory_space<vmem>>, %arg4: memref<1x8x512xf32, #tpu.memory_space<vmem>>, %arg5: memref<1x1x8x2xf32, #tpu.memory_space<vmem>>) attributes {dimension_semantics = [#tpu.dimension_semantics<parallel>, #tpu.dimension_semantics<parallel>], iteration_bounds = array<i64: 2, 1>, scalar_prefetch = 0 : i64, scratch_operands = 0 : i64, tpu.core_type = #tpu.core_type<tc>, window_params = [{pipeline_mode = #tpu.pipeline_mode<synchronous>, transform_indices = @transform_0, window_bounds = array<i64: 8, 108>}, {transform_indices = @transform_1, window_bounds = array<i64: 1, 108, 512>}, {transform_indices = @transform_2, window_bounds = array<i64: 1, 8, 512>}, {transform_indices = @transform_3, window_bounds = array<i64: 1, 1, 8, 2>}]} {
    %c0 = arith.constant 0 : index
    %c0_0 = arith.constant 0 : index
    %0 = vector.load %arg2[%c0, %c0_0] : memref<8x108xbf16, #tpu.memory_space<vmem>>, vector<8x108xbf16>
    %c0_1 = arith.constant 0 : index
    %c0_2 = arith.constant 0 : index
    %c0_3 = arith.constant 0 : index
    %1 = vector.load %arg3[%c0_1, %c0_2, %c0_3] : memref<1x108x512xbf16, #tpu.memory_space<vmem>>, vector<1x108x512xbf16>
    %2 = vector.shape_cast %1 : vector<1x108x512xbf16> to vector<108x512xbf16>
    %cst = arith.constant dense<0.000000e+00> : vector<8x512xf32>
    %3 = tpu.matmul %0, %2, %cst {dimension_numbers = #tpu.dot_dimension_numbers<[1], [0], [0], [1], [0, 0, 1, 1], [], []>} : vector<8x108xbf16>, vector<108x512xbf16>, vector<8x512xf32> -> vector<8x512xf32>
    %c0_4 = arith.constant 0 : index
    %c0_5 = arith.constant 0 : index
    %c0_6 = arith.constant 0 : index
    %4 = vector.load %arg4[%c0_4, %c0_5, %c0_6] : memref<1x8x512xf32, #tpu.memory_space<vmem>>, vector<1x8x512xf32>
    %5 = vector.shape_cast %4 : vector<1x8x512xf32> to vector<8x512xf32>
    %6 = vector.shape_cast %3 : vector<8x512xf32> to vector<1x8x512xf32>
    tpu.vector_store %arg4[%c0_4, %c0_5, %c0_6], %6 {strides = array<i32>} : memref<1x8x512xf32, #tpu.memory_space<vmem>>, vector<1x8x512xf32>,
    %cst_7 = arith.constant dense<0.000000e+00> : vector<8xf32>
    %7 = vector.multi_reduction <add>, %3, %cst_7 [1] : vector<8x512xf32> to vector<8xf32>
    %8 = vector.shape_cast %7 : vector<8xf32> to vector<8x1xf32>
    %c0_8 = arith.constant 0 : index
    %c0_9 = arith.constant 0 : index
    %c0_10 = arith.constant 0 : index
    %c0_11 = arith.constant 0 : index
    %9 = vector.load %arg5[%c0_8, %c0_9, %c0_10, %c0_11] : memref<1x1x8x2xf32, #tpu.memory_space<vmem>>, vector<1x1x8x1xf32>
    %10 = vector.shape_cast %9 : vector<1x1x8x1xf32> to vector<8x1xf32>
    %11 = vector.shape_cast %8 : vector<8x1xf32> to vector<1x1x8x1xf32>
    tpu.vector_store %arg5[%c0_8, %c0_9, %c0_10, %c0_11], %11 {strides = array<i32>} : memref<1x1x8x2xf32, #tpu.memory_space<vmem>>, vector<1x1x8x1xf32>,
    %12 = arith.mulf %3, %3 : vector<8x512xf32>
    %cst_12 = arith.constant dense<0.000000e+00> : vector<8xf32>
    %13 = vector.multi_reduction <add>, %12, %cst_12 [1] : vector<8x512xf32> to vector<8xf32>
    %14 = vector.shape_cast %13 : vector<8xf32> to vector<8x1xf32>
    %c0_13 = arith.constant 0 : index
    %c0_14 = arith.constant 0 : index
    %c0_15 = arith.constant 0 : index
    %c1 = arith.constant 1 : index
    %15 = vector.load %arg5[%c0_13, %c0_14, %c0_15, %c1] : memref<1x1x8x2xf32, #tpu.memory_space<vmem>>, vector<1x1x8x1xf32>
    %16 = vector.shape_cast %15 : vector<1x1x8x1xf32> to vector<8x1xf32>
    %17 = vector.shape_cast %14 : vector<8x1xf32> to vector<1x1x8x1xf32>
    tpu.vector_store %arg5[%c0_13, %c0_14, %c0_15, %c1], %17 {strides = array<i32>} : memref<1x1x8x2xf32, #tpu.memory_space<vmem>>, vector<1x1x8x1xf32>,
    return
  }
  func.func @transform_0(%arg0: i32, %arg1: i32) -> (i32, i32) {
    %c0_i32 = arith.constant 0 : i32
    %c0_i32_0 = arith.constant 0 : i32
    %c0_i32_1 = arith.constant 0 : i32
    return %c0_i32, %c0_i32_0 : i32, i32
  }
  func.func @transform_1(%arg0: i32, %arg1: i32) -> (i32, i32, i32) {
    %c0_i32 = arith.constant 0 : i32
    %c0_i32_0 = arith.constant 0 : i32
    return %arg0, %c0_i32, %arg1 : i32, i32, i32
  }
  func.func @transform_2(%arg0: i32, %arg1: i32) -> (i32, i32, i32) {
    %c0_i32 = arith.constant 0 : i32
    %c0_i32_0 = arith.constant 0 : i32
    return %arg0, %c0_i32, %arg1 : i32, i32, i32
  }
  func.func @transform_3(%arg0: i32, %arg1: i32) -> (i32, i32, i32, i32) {
    %c0_i32 = arith.constant 0 : i32
    %c0_i32_0 = arith.constant 0 : i32
    %c0_i32_1 = arith.constant 0 : i32
    return %arg0, %arg1, %c0_i32, %c0_i32_0 : i32, i32, i32, i32
  }
}

</mosaic_0001>

<bundles_post_ra>
// kernel: tpu_custom_call.1
= control target key start
LH: loop header
LB: loop body
LE: loop exit
PB: predicated region body
PF: predicated region fallthrough
CT: control target
= control target key end

     0   :  { %9 = vsyncpa [#allocation3], 0  ;;  %s1028_s0 = inlined_call_operand.vmem [shape: bf16[8,108], index: 0, kind: input, shape index: {}]   ;;  %s1029_s1 = inlined_call_operand.vmem [shape: bf16[2,108,512], index: 1, kind: input, shape index: {}]   ;;  %s1030_s2 = inlined_call_operand.hbm [shape: f32[2,8,512], index: 2, kind: output, shape index: {0}]   ;;  %s1031_s3 = inlined_call_operand.vmem [shape: f32[2,1,8,2], index: 3, kind: output, shape index: {1}]  }
   0x1   :  { %11 = vsyncpa [#allocation3 + $0x1], 0  ;;  %s885_s12 = smov 0   ;;  %s887_s13 = smov 0  }
   0x2   :  { %s889_s14 = smov 0   ;;  %s891_s15 = smov 0  }
   0x3   :  { %s893_s16 = smov 0   ;;  %s895_s17 = smov 0  }
   0x4 LB: > { %s640_s18 = sadd.s32 4294967295, %s861_s17   ;;  %s641_s19 = sadd.s32 4294967294, %s861_s17   ;;  %s861_s17 = sphi %s895_s17, %s17_s17   ;;  %s857_s16 = sphi %s893_s16, %s1038_s16   ;;  %s853_s15 = sphi %s891_s15, %s1037_s15   ;;  %s849_s14 = sphi %s889_s14, %s1036_s14   ;;  %s845_s13 = sphi %s887_s13, %s1035_s13   ;;  %s841_s12 = sphi %s885_s12, %s1034_s12  }
   0x5   : > { %s29_s20 = sadd.s32 1, %s857_s16  ;;  %s87_s21 = sadd.s32 1, %s849_s14 }
   0x6   : > { %p31_p0 = scmp.ge.s32.totalorder %s29_s20, 2  ;;  %p97_p1 = scmp.ne.s32.totalorder %s849_s14, %s845_s13 }
   0x7   : > { %p98_p2 = scmp.eq.s32.totalorder %s640_s18, 1  ;;  %p103_p3 = scmp.ne.s32.totalorder %s845_s13, %s841_s12 }
   0x8   : > { %s1040_s20 = smov (%p31_p0, %s29_s20), 0  ;;  %p104_p5 = scmp.eq.s32.totalorder %s641_s19, 1 }
   0x9   : > { %p925_p4 = por %p98_p2, %p97_p1  ;;  %s82_s23 = ssub.s32 %s857_s16, %s1040_s20 }
   0xa   : > { %p644_p6 = scmp.ge.s32.totalorder %s861_s17, 1  ;;  %p85_p7 = scmp.eq.s32.totalorder %s82_s23, 0 }
   0xb   : > { %p932_p8 = por %p104_p5, %p103_p3  ;;  %p166_p9 = scmp.lt.s32.totalorder %s861_s17, 3 }
   0xc   : > { %s938_s25 = scalar_select %p85_p7, %s849_s14, %s87_s21  }
   0xd   : > { %p167_p10 = pnand %p644_p6, %p166_p9 }
   0xe   : > { %p202_p11 = scmp.lt.s32.totalorder (!%p167_p10), %s853_s15, 1  ;;  %s189_s6 = sand.u32 (!%p167_p10), 1, %s845_s13  }
   0xf   : > { %170 = sbr.rel (%p167_p10) target bundleno = 399 (0x18f), region = 28  ;;  %s645_s7 = sshll.u32 (!%p167_p10), %s189_s6, 5 }
  0x10   : > { %s191_s8 = scalar_lea.vmem (!%p167_p10), [#allocation2], %s645_s7  ;;  %s685_s9 = sshll.u32 (!%p167_p10), %s853_s15, 9 }
  0x11   : > { %s530_s10 = sshll.u32 (!%p167_p10), %s191_s8, 4  ;;  %s528_s19 = scalar_lea.hbm (!%p167_p10), %s1030_s2, %s685_s9  ;;  %s531_s10 = int_to_ptr.vmem [resolvable:$true] %s530_s10 }
  0x12   : > { %s507_s21 = scalar_lea.sflag (!%p167_p10), [#allocation3], %s189_s6  ;;  %s785_s23 = scalar_lea.vmem (!%p167_p10), %s531_s10, 512 }
  0x13   : > { %p786_p12 = scmp.ne.s32.totalorder (!%p167_p10), %s531_s10, %s785_s23 }
  0x14   : > { %v863_v0 = vmov 0   ;;  %s942_s26 = scalar_select %p202_p11, %s853_s15, 1  ;;  %vm389_vm0 = vcmask 1045504   ;;  %v220_v31 = vld [vmem:[%s1028_s0] sm:$0xf]  ;;  %vm385_vm1 = vcmask 883712  }
  0x15   : > { %434 = vmatprep.mubr.bf16.mxu0 %v863_v0  ;;  %475 = vmatprep.mubr.bf16.mxu1 %v863_v0  ;;  %p787_p13 = pnand %p786_p12, %p925_p4 }
  0x16   : > { %s686_s27 = smul.u32 224, %s942_s26 }
  0x17   : > { %p788_p0 = pneg %p787_p13 }
  0x18   : > { %s948_s30 = scalar_lea.vmem %s1029_s1, %s686_s27  ;;  %s864_s27 = smov [#allocation2]  }
  0x19   : > { %v743_v1 = vld [vmem:[%s948_s30 + $0xc4] ss:$16 sps:$4 sm:$0x3f]   ;;  %v745_v2 = vld [vmem:[%s948_s30 + $0xcc] ss:$16 sps:$4 sm:$0x3f]  }
  0x1a   : > { %676 = vmatprep.subr.msk.bf16.mxu0 %vm389_vm0, %v743_v1  ;;  %v747_v3 = vld [vmem:[%s948_s30 + $0xc0] ss:$16 sps:$4 sm:$0x3f]   ;;  %v748_v4 = vld [vmem:[%s948_s30 + $0xc8] ss:$16 sps:$4 sm:$0x3f]   ;;  %678 = vmatprep.subr.msk.bf16.mxu1 %vm389_vm0, %v745_v2 }
  0x1b   : > { %v749_v5 = vld [vmem:[%s948_s30 + $0xa4] ss:$16 sps:$4 sm:$0xff]   ;;  %v391_v6 = vsel %vm389_vm0, %v747_v3, 0  ;;  %v397_v7 = vsel %vm389_vm0, %v748_v4, 0  ;;  %v751_v8 = vld [vmem:[%s948_s30 + $0xac] ss:$16 sps:$4 sm:$0xff]  }
  0x1c   : > { %405 = vmatpush1.bf16.msra.mxu0 %v391_v6  ;;  %446 = vmatpush1.bf16.msra.mxu1 %v397_v7  ;;  %v753_v9 = vld [vmem:[%s948_s30 + $0xa0] ss:$16 sps:$4 sm:$0xff]   ;;  %v754_v10 = vld [vmem:[%s948_s30 + $0xa8] ss:$16 sps:$4 sm:$0xff]   ;;  %v755_v11 = vld [vmem:[%s948_s30 + $0x84] ss:$16 sps:$4 sm:$0xff]  }
  0x1d   : > { %406 = vmatprep.subr.bf16.mxu0 %v749_v5  ;;  %447 = vmatprep.subr.bf16.mxu1 %v751_v8  ;;  %v757_v12 = vld [vmem:[%s948_s30 + $0x8c] ss:$16 sps:$4 sm:$0xff]   ;;  %v759_v13 = vld [vmem:[%s948_s30 + $0x80] ss:$16 sps:$4 sm:$0xff]   ;;  %v760_v14 = vld [vmem:[%s948_s30 + $0x88] ss:$16 sps:$4 sm:$0xff]  }
  0x1e   : > { %v761_v15 = vld [vmem:[%s948_s30 + $0x64] ss:$16 sps:$4 sm:$0xff]   ;;  %v763_v16 = vld [vmem:[%s948_s30 + $0x6c] ss:$16 sps:$4 sm:$0xff]   ;;  %v765_v17 = vld [vmem:[%s948_s30 + $0x60] ss:$16 sps:$4 sm:$0xff]  }
  0x1f   : > { %v766_v18 = vld [vmem:[%s948_s30 + $0x68] ss:$16 sps:$4 sm:$0xff]   ;;  %v767_v19 = vld [vmem:[%s948_s30 + $0x44] ss:$16 sps:$4 sm:$0xff]   ;;  %v769_v20 = vld [vmem:[%s948_s30 + $0x4c] ss:$16 sps:$4 sm:$0xff]  }
  0x20   : > { %407 = vmatpush1.bf16.msra.mxu0 %v753_v9  ;;  %448 = vmatpush1.bf16.msra.mxu1 %v754_v10  ;;  %v771_v21 = vld [vmem:[%s948_s30 + $0x40] ss:$16 sps:$4 sm:$0xff]   ;;  %v772_v22 = vld [vmem:[%s948_s30 + $0x48] ss:$16 sps:$4 sm:$0xff]   ;;  %v773_v23 = vld [vmem:[%s948_s30 + $0x24] ss:$16 sps:$4 sm:$0xff]  }
  0x21   : > { %408 = vmatprep.subr.bf16.mxu0 %v755_v11  ;;  %449 = vmatprep.subr.bf16.mxu1 %v757_v12  ;;  %v775_v24 = vld [vmem:[%s948_s30 + $0x2c] ss:$16 sps:$4 sm:$0xff]   ;;  %v777_v25 = vld [vmem:[%s948_s30 + $0x20] ss:$16 sps:$4 sm:$0xff]   ;;  %v778_v26 = vld [vmem:[%s948_s30 + $0x28] ss:$16 sps:$4 sm:$0xff]  }
  0x22   : > { %v779_v27 = vld [vmem:[%s948_s30 + $0x4] ss:$16 sps:$4 sm:$0xff]   ;;  %v781_v28 = vld [vmem:[%s948_s30 + $0xc] ss:$16 sps:$4 sm:$0xff]   ;;  %v783_v29 = vld [vmem:[%s948_s30] ss:$16 sps:$4 sm:$0xff]  }
  0x23   : > { %v784_v30 = vld [vmem:[%s948_s30 + $0x8] ss:$16 sps:$4 sm:$0xff]   ;;  %s789_s28 = sshll.u32 %s864_s27, 4  ;;  %s790_s28 = int_to_ptr.vmem [resolvable:$false] %s789_s28 }
  0x24   : > { %409 = vmatpush1.bf16.msra.mxu0 %v759_v13  ;;  %450 = vmatpush1.bf16.msra.mxu1 %v760_v14  ;;  %s791_s29 = scalar_lea.vmem %s790_s28, 1024  ;;  %p792_p1 = scmp.lt.s32.totalorder %s531_s10, %s790_s28 }
  0x25   : > { %410 = vmatprep.subr.bf16.mxu0 %v761_v15  ;;  %451 = vmatprep.subr.bf16.mxu1 %v763_v16  ;;  %p793_p2 = scmp.lt.s32.totalorder %s791_s29, %s785_s23 }
  0x27   : > { %p794_p3 = por %p793_p2, %p792_p1 }
  0x28   : > { %411 = vmatpush1.bf16.msra.mxu0 %v765_v17  ;;  %452 = vmatpush1.bf16.msra.mxu1 %v766_v18 }
  0x29   : > { %412 = vmatprep.subr.bf16.mxu0 %v767_v19  ;;  %453 = vmatprep.subr.bf16.mxu1 %v769_v20  ;;  %p795_p5 = pnand %p794_p3, %p788_p0 }
  0x2c   : > { %413 = vmatpush1.bf16.msra.mxu0 %v771_v21  ;;  %454 = vmatpush1.bf16.msra.mxu1 %v772_v22 }
  0x2d   : > { %414 = vmatprep.subr.bf16.mxu0 %v773_v23  ;;  %455 = vmatprep.subr.bf16.mxu1 %v775_v24 }
  0x30   : > { %415 = vmatpush1.bf16.msra.mxu0 %v777_v25  ;;  %456 = vmatpush1.bf16.msra.mxu1 %v778_v26 }
  0x31   : > { %416 = vmatprep.subr.bf16.mxu0 %v779_v27  ;;  %457 = vmatprep.subr.bf16.mxu1 %v781_v28 }
  0x34   : > { %417 = vmatpush1.bf16.msra.mxu0 %v783_v29  ;;  %458 = vmatpush1.bf16.msra.mxu1 %v784_v30 }
  0x37   : > { %677 = vmatmul.mubr.msk.bf16.vlgmr.msra.gmra.mxu0 %vm385_vm1, %v220_v31  ;;  %679 = vmatmul.mubr.msk.bf16.vlgmr.msra.gmra.mxu1 %vm385_vm1, %v220_v31 }
  0xf7   : > { %v436_v32 = vpop.f32.mrf.mxu0  ;;  %v477_v33 = vpop.f32.mrf.mxu1 }
  0xf8   : > { %484 = vst [vmem:[%s191_s8] sm:$0xff] %v436_v32  ;;  %486 = vst [vmem:[%s191_s8 + $0x10] sm:$0xff] %v477_v33  ;;  %v495_v36 = vmul.f32 %v436_v32, %v436_v32  ;;  %v497_v37 = vmul.f32 %v477_v33, %v477_v33 }
  0xf9   : > { %v438_v34 = vpop.f32.mrf.mxu0  ;;  %v479_v35 = vpop.f32.mrf.mxu1 }
  0xfa   : > { %485 = vst [vmem:[%s191_s8 + $0x8] sm:$0xff] %v438_v34  ;;  %v488_v38 = vadd.f32 %v438_v34, %v436_v32  ;;  %v496_v39 = vmul.f32 %v438_v34, %v438_v34  ;;  %487 = vst [vmem:[%s191_s8 + $0x18] sm:$0xff] %v479_v35  ;;  %v498_v48 = vmul.f32 %v479_v35, %v479_v35 }
  0xfb   : > { %v440_v40 = vpop.f32.mrf.mxu0  ;;  %v481_v41 = vpop.f32.mrf.mxu1 }
  0xfc   : > { %v489_v42 = vadd.f32 %v488_v38, %v477_v33  ;;  %v499_v43 = vadd.f32 %v496_v39, %v495_v36 }
  0xfd   : > { %v441_v44 = vpop.f32.mrf.mxu0  ;;  %v482_v45 = vpop.f32.mrf.mxu1 }
  0xfe   : > { %v490_v46 = vadd.f32 %v489_v42, %v479_v35  ;;  %v500_v47 = vadd.f32 %v499_v43, %v497_v37 }
 0x100   : > { %491 = vadd.xlane.f32.xlu0 %v490_v46  ;;  %v501_v49 = vadd.f32 %v500_v47, %v498_v48 }
 0x104   : > { %502 = vadd.xlane.f32.xlu0 %v501_v49 }
 0x105   : > { %798 = shalt.err (!%p795_p5)
}
 0x106   : > { %s799_s15 = scalar_lea.hbm %s528_s19, 512  ;;  %s803_s5 = scalar_lea.hbm %s1030_s2, 1024 }
 0x107   : > { %p800_p6 = scmp.ne.s32.totalorder %s528_s19, %s799_s15  ;;  %p804_p10 = scmp.lt.s32.totalorder %s528_s19, %s1030_s2 }
 0x108   : > { %p805_p11 = scmp.lt.s32.totalorder %s803_s5, %s799_s15 }
 0x109   : > { %p801_p7 = pnand %p800_p6, %p925_p4 }
 0x10a   : > { %p806_p12 = por %p805_p11, %p804_p10 }
 0x10b   : > { %p802_p9 = pneg %p801_p7 }
 0x10d   : > { %p807_p13 = pnand %p806_p12, %p802_p9 }
 0x10f   : > { %810 = shalt.err (!%p807_p13)
}
 0x110   : > { %687 = dma.vmem_to_hbm [thread:$0]  (%p925_p4), %s531_s10, 512, %s528_s19, %s507_s21   ;;  %vm493_vm2 = vcmask 7168   ;;  %vm504_vm3 = vcmask 15368  }
 0x111   : > { %s647_s8 = sshll.u32 %s942_s26, 3 }
 0x112   : > { %s218_s18 = scalar_lea.vmem %s1031_s3, %s647_s8 }
 0x189   : > { %v492_v50 = vpop.xlane.xlu0 %491 }
 0x18a   : > { %494 = vst.msk [vmem:[%s218_s18] sm:$0xff] %vm493_vm2, %v492_v50 }
 0x18d   : > { %v503_v51 = vpop.xlane.xlu0 %502 }
 0x18e   : > { %505 = vst.msk [vmem:[%s218_s18] sm:$0xff] %vm504_vm3, %v503_v51 }
 0x18f PF: > { %p693_p0 = scmp.ge.s32.totalorder %s861_s17, 2  ;;  %s545_s23 = sand.u32 1, %s841_s12  }
 0x190   : > { %s546_s22 = scalar_lea.sflag [#allocation3], %s545_s23 }
 0x191   : > { %p690_p1 = pnand %p693_p0, %p932_p8 }
 0x193   : > { %p691_p4 = pneg %p690_p1 }
 0x195   : > { %836 = dma.done.wait (%p691_p4), %s546_s22, 512  }
 0x196   : > { %838 = vsyncadd (%p691_p4), %s546_s22, 4294966784  ;;  %s17_s17 = sadd.s32 1, %s861_s17   ;;  %s1034_s12 = smov %s845_s13 }
 0x197   : > { %p14_p2 = scmp.ge.s32.totalorder %s17_s17, 4   ;;  %s1035_s13 = smov %s849_s14 }
 0x198   : > { %s1036_s14 = smov %s938_s25  ;;  %s1037_s15 = smov %s857_s16 }
 0x199   : > { %s1038_s16 = smov %s1040_s20  ;;  %16 = sbr.rel (!%p14_p2) target bundleno = 4 (0x4), region = 75 }
 0x19e   :  { %561 = vsyncpa [#allocation3], 1 }
 0x19f   :  { %563 = vsyncpa [#allocation3 + $0x1], 1 }

</bundles_post_ra>
